<compile_context>
chip_gen: v5e
topology: v5e:2x2
jax: 0.10.0
libtpu: 0.0.40
codegen_flags: <defaults>
</compile_context>

<pallas_src>
import math

import numpy as np
import jax
import jax.numpy as jnp
from jax import lax
from jax.experimental import pallas as pl
from jax.experimental.pallas import tpu as pltpu

LANE = 128
SUB = 8
BN_EPS = 1e-5


def log2_diff(a, b):
    return int(round(math.log2(a) - math.log2(b)))


def round_up(x, m):
    return (x + m - 1) // m * m


# ----------------------------------------------------------------------------
# Static network plan
# ----------------------------------------------------------------------------
def make_plan(input_imsize, smallest_imsize, z_dims, nc_in, nc_base,
              n_layers_per_res):
    n_down = log2_diff(input_imsize, smallest_imsize)
    nc = [min(z_dims, nc_base * 2 ** i) for i in range(n_down + 1)]
    assert len(n_layers_per_res) == n_down
    assert max(nc) <= z_dims and z_dims == nc[-1] and nc[0] == nc_base
    assert nc_base % SUB == 0, "this kernel assumes nc_base is a multiple of 8"

    def geom(H):
        Wp = H + 2
        Sp = Wp * Wp
        return Wp, Sp, round_up(Sp, LANE)

    plan = []

    def add(H, ci, co, pool):
        Wp, Sp, Spad = geom(H)
        plan.append(dict(H=H, Wp=Wp, Sp=Sp, Spad=Spad, cin=ci,
                         cin_pad=round_up(ci, SUB), cout=co, pool=pool))

    H = input_imsize
    add(H, nc_in, nc[0], False)                       # stem ConvBlock
    # TODO(synk): FancyMultiLayerDownBlock internals assumed:
    #   ConvBlock(nc_i, nc_{i+1}) + (n-1)*ConvBlock(nc_{i+1}) + 2x2 avg pool.
    for i in range(n_down):
        for l in range(n_layers_per_res[i]):
            ci = nc[i] if l == 0 else nc[i + 1]
            add(H, ci, nc[i + 1], l == n_layers_per_res[i] - 1)
        H //= 2
    for L in plan:
        assert L['cout'] % SUB == 0
    assert plan[-1]['pool']
    return plan


# ----------------------------------------------------------------------------
# pltpu.roll sign-convention probe (guards against convention drift; runs once)
# ----------------------------------------------------------------------------
_ROLL_IS_JNP = None


def roll_follows_jnp_convention():
    global _ROLL_IS_JNP
    if _ROLL_IS_JNP is None:
        def k(x_ref, o_ref):
            o_ref[...] = pltpu.roll(x_ref[...], 1, axis=1)

        x = jnp.tile(jnp.arange(LANE, dtype=jnp.float32)[None, :], (SUB, 1))
        y = pl.pallas_call(
            k, out_shape=jax.ShapeDtypeStruct((SUB, LANE), jnp.float32))(x)
        v = float(y[0, 0])
        if v == float(LANE - 1):
            _ROLL_IS_JNP = True       # result[i] = x[i - shift]  (jnp.roll)
        elif v == 1.0:
            _ROLL_IS_JNP = False      # result[i] = x[i + shift]
        else:
            raise RuntimeError("unexpected pltpu.roll semantics")
    return _ROLL_IS_JNP


# ----------------------------------------------------------------------------
# Helper matrices (built once in the wrapper / init; all tiny)
# ----------------------------------------------------------------------------
def make_pool_to_plane_matrix(H, Spad_in, Spad_out):
    """2x2 avg-pool of a conv output (top-left anchored padded domain) into the
    INTERIOR of the next, half-resolution padded plane (ring/junk cols = 0)."""
    Wp_in = H + 2
    Ho = H // 2
    Wp_out = Ho + 2
    T = np.zeros((Spad_in, Spad_out), np.float32)
    for io in range(Ho):
        for jo in range(Ho):
            p_out = (io + 1) * Wp_out + (jo + 1)
            for a in (0, 1):
                for c in (0, 1):
                    T[(2 * io + a) * Wp_in + (2 * jo + c), p_out] = 0.25
    return jnp.asarray(T)


def make_pool_to_flat_matrix(H, Spad_in):
    """2x2 avg-pool into a compact (Ho*Wo)-column block feeding the FC."""
    Wp_in = H + 2
    Ho = H // 2
    T = np.zeros((Spad_in, Ho * Ho), np.float32)
    for io in range(Ho):
        for jo in range(Ho):
            q = io * Ho + jo
            for a in (0, 1):
                for c in (0, 1):
                    T[(2 * io + a) * Wp_in + (2 * jo + c), q] = 0.25
    return jnp.asarray(T)


def make_interior_mask(H, Spad, B):
    """1.0 on the interior of the padded plane, 0.0 on the ring / junk lanes."""
    Wp = H + 2
    m = np.zeros((Spad,), np.float32)
    for i in range(H):
        for j in range(H):
            m[(i + 1) * Wp + (j + 1)] = 1.0
    return jnp.asarray(np.tile(m, B)[None, :])


# ----------------------------------------------------------------------------
# Fused kernel builder
# ----------------------------------------------------------------------------
def build_kernel(plan, B, s_last, mask_res, roll_is_jnp):
    n_conv = len(plan)
    n_pool = sum(1 for L in plan if L['pool'])

    def read_ahead(x, d, lanes):          # result[:, p] = x[:, (p + d) % lanes]
        if d == 0:
            return x
        s = (lanes - d) if roll_is_jnp else d
        return pltpu.roll(x, s, axis=1)

    def read_behind(x, d, lanes):         # result[:, p] = x[:, (p - d) % lanes]
        s = d if roll_is_jnp else (lanes - d)
        return pltpu.roll(x, s, axis=1)

    def mish(y):
        # single-transcendental Mish:  y * tanh(softplus(y)) == y*(t-1)/(t+1)
        e = jnp.exp(jnp.minimum(y, 20.0))
        t = (1.0 + e) * (1.0 + e)
        return jnp.where(y > 20.0, y,
                         y * (t - 1.0) * pl.reciprocal(t + 1.0, approx=True))

    def kernel(*refs):
        x_ref = refs[0]
        conv_refs = refs[1:1 + 2 * n_conv]
        base = 1 + 2 * n_conv
        mask_refs = {H: refs[base + k] for k, H in enumerate(mask_res)}
        base += len(mask_res)
        pool_refs = refs[base:base + n_pool]
        wfc_ref = refs[base + n_pool]
        bfc_ref = refs[base + n_pool + 1]
        o_ref = refs[base + n_pool + 2]

        plane = x_ref[0]                       # (cin_pad0, B*Spad0), ring/junk = 0
        pool_i = 0
        feats = None
        for li, L in enumerate(plan):
            H, Wp, Spad, cout, pool = L['H'], L['Wp'], L['Spad'], L['cout'], L['pool']
            lanes = B * Spad
            # --- 3x3 conv (pad 1) as one lane-dense matmul; im2col rows built
            #     with XLU lane rolls of the padded plane (no masked stores). ---
            taps = [read_ahead(plane, kh * Wp + kw, lanes)
                    for kh in range(3) for kw in range(3)]
            patch = jnp.concatenate(taps, axis=0)            # (9*cin, B*Spad)
            y = jnp.dot(conv_refs[2 * li][...], patch,
                        preferred_element_type=jnp.float32)  # (cout, B*Spad)
            y = y + conv_refs[2 * li + 1][...]               # folded BN / bias
            a = mish(y)
            if not pool:
                # re-anchor output into the padded-plane interior; zero ring/junk
                plane = read_behind(a, Wp + 1, lanes) * mask_refs[H][...]
            else:
                T = pool_refs[pool_i][...]
                pool_i += 1
                # per-image aligned lane slices (Spad is a multiple of 128);
                # pool matrix memory stays O(1) in B.
                pieces = [jnp.dot(a[:, b * Spad:(b + 1) * Spad], T,
                                  preferred_element_type=jnp.float32)
                          for b in range(B)]
                if li + 1 < n_conv:
                    plane = jnp.concatenate(pieces, axis=1)  # next padded plane
                else:
                    feats = pieces                           # each (c_last, s_last)

        # --- final FC (flatten + Linear), PyTorch NCHW order recovered by the
        #     wrapper-permuted weight columns (order q*C + c). ---
        wfc = wfc_ref[...]
        zs = []
        for b in range(B):
            fcin = jnp.concatenate([feats[b][:, q:q + 1] for q in range(s_last)],
                                   axis=0)                   # (s_last*c_last, 1)
            zs.append(jnp.dot(wfc, fcin, preferred_element_type=jnp.float32))
        o_ref[0] = jnp.concatenate(zs, axis=1) + bfc_ref[...]   # (z_dims, B)

    return kernel


# ----------------------------------------------------------------------------
# Parameter construction (deterministic, synthetic) with BN folding
# ----------------------------------------------------------------------------
def init_z_encoder(key, input_imsize=16, smallest_imsize=4, z_dims=32,
                   nc_in=3, nc_base=8, n_layers_per_res=(2, 2)):
    plan = make_plan(input_imsize, smallest_imsize, z_dims, nc_in, nc_base,
                     n_layers_per_res)
    keys = iter(jax.random.split(key, 8 * len(plan) + 8))

    raw_convs = []
    folded = []
    for L in plan:
        ci, co, cin_pad = L['cin'], L['cout'], L['cin_pad']
        w = jax.random.normal(next(keys), (co, ci, 3, 3),
                              jnp.float32) * math.sqrt(2.0 / (9.0 * ci))
        b = 0.05 * jax.random.normal(next(keys), (co,), jnp.float32)
        gamma = 1.0 + 0.1 * jax.random.normal(next(keys), (co,), jnp.float32)
        beta = 0.1 * jax.random.normal(next(keys), (co,), jnp.float32)
        mean = 0.1 * jax.random.normal(next(keys), (co,), jnp.float32)
        var = jax.random.uniform(next(keys), (co,), jnp.float32, 0.5, 1.5)
        raw_convs.append((w, b, gamma, beta, mean, var))
        # fold eval-mode BN into the conv:  y = conv(x)*scale + shift
        scale = np.asarray(gamma / jnp.sqrt(var + BN_EPS))
        wn = np.asarray(w)
        W2 = np.zeros((co, 9 * cin_pad), np.float32)
        for kh in range(3):
            for kw in range(3):
                t = kh * 3 + kw
                W2[:, t * cin_pad:t * cin_pad + ci] = wn[:, :, kh, kw] * scale[:, None]
        shift = np.asarray(beta + (b - mean) * (gamma / jnp.sqrt(var + BN_EPS)))
        folded.append((jnp.asarray(W2), jnp.asarray(shift.reshape(co, 1))))

    # pooling (+ re-pad) matrices, per image (O(1) in batch size)
    pools = []
    for idx, L in enumerate(plan):
        if not L['pool']:
            continue
        if idx + 1 < len(plan):
            Ho = L['H'] // 2
            pools.append(make_pool_to_plane_matrix(
                L['H'], L['Spad'], round_up((Ho + 2) ** 2, LANE)))
        else:
            pools.append(make_pool_to_flat_matrix(L['H'], L['Spad']))

    # TODO(synk): FeatMapToLatentViaFc internals unknown; using flatten + Linear.
    c_last = plan[-1]['cout']
    s_last = smallest_imsize * smallest_imsize
    feat = c_last * s_last
    fc_w = jax.random.normal(next(keys), (feat, z_dims),
                             jnp.float32) * math.sqrt(1.0 / feat)   # torch order c*s+q
    fc_b = 0.05 * jax.random.normal(next(keys), (z_dims,), jnp.float32)
    V = np.asarray(fc_w).reshape(c_last, s_last, z_dims)
    fc_w_k = jnp.asarray(np.ascontiguousarray(
        np.transpose(V, (1, 0, 2)).reshape(feat, z_dims).T))          # (Z, s*C), col q*C+c
    fc_b_k = jnp.asarray(np.asarray(fc_b).reshape(z_dims, 1))

    mask_res_geom = []
    for H in sorted({L['H'] for L in plan if not L['pool']}, reverse=True):
        Spad = next(L['Spad'] for L in plan if L['H'] == H)
        mask_res_geom.append((H, Spad))

    return dict(
        raw_convs=raw_convs, raw_fc=(fc_w, fc_b),
        convs_folded=folded, pools=pools, fc_w_k=fc_w_k, fc_b_k=fc_b_k,
        roll_is_jnp=roll_follows_jnp_convention(),
        cfg=dict(plan=plan, z_dims=z_dims, c_last=c_last, s_last=s_last,
                 mask_res_geom=mask_res_geom))


# ----------------------------------------------------------------------------
# Forward pass (single fused pallas_call)
# ----------------------------------------------------------------------------
def z_encoder_forward(params, x_nchw, num_ws=None, images_per_step=2):
    cfg = params['cfg']
    plan = cfg['plan']
    z_dims, s_last = cfg['z_dims'], cfg['s_last']
    N = x_nchw.shape[0]
    B = images_per_step
    assert N % B == 0, "batch must be divisible by images_per_step"
    G = N // B

    L0 = plan[0]
    cin_pad0, Sp0, Spad0 = L0['cin_pad'], L0['Sp'], L0['Spad']

    # Input prep with free XLA ops: pad channels to a multiple of 8, add the
    # 1-px zero ring, flatten to the channel-major padded lane layout.
    xp = jnp.pad(x_nchw.astype(jnp.float32),
                 ((0, 0), (0, cin_pad0 - x_nchw.shape[1]), (1, 1), (1, 1)))
    xp = xp.reshape(N, cin_pad0, Sp0)
    xp = jnp.pad(xp, ((0, 0), (0, 0), (0, Spad0 - Sp0)))
    xp = xp.reshape(G, B, cin_pad0, Spad0).transpose(0, 2, 1, 3)
    xp = xp.reshape(G, cin_pad0, B * Spad0)

    mask_res = [H for (H, _) in cfg['mask_res_geom']]
    kernel = build_kernel(plan, B, s_last, mask_res, params['roll_is_jnp'])

    def fullspec(a):
        return pl.BlockSpec(a.shape, lambda g, nd=a.ndim: (0,) * nd)

    ins = [xp]
    specs = [pl.BlockSpec((1, cin_pad0, B * Spad0), lambda g: (g, 0, 0))]
    for (w2, sh) in params['convs_folded']:
        ins += [w2, sh]
        specs += [fullspec(w2), fullspec(sh)]
    for (H, Spad) in cfg['mask_res_geom']:
        m = make_interior_mask(H, Spad, B)
        ins.append(m)
        specs.append(fullspec(m))
    for T in params['pools']:
        ins.append(T)
        specs.append(fullspec(T))
    ins += [params['fc_w_k'], params['fc_b_k']]
    specs += [fullspec(params['fc_w_k']), fullspec(params['fc_b_k'])]

    out = pl.pallas_call(
        kernel,
        out_shape=jax.ShapeDtypeStruct((G, z_dims, B), jnp.float32),
        grid=(G,),
        in_specs=specs,
        out_specs=pl.BlockSpec((1, z_dims, B), lambda g: (g, 0, 0)),
        compiler_params=pltpu.CompilerParams(
            dimension_semantics=("parallel",),       # keeps the v7x 2-TC split
            vmem_limit_bytes=32 * 1024 * 1024),      # explicit budget (usage ~3 MiB)
    )(*ins)

    z = out.transpose(0, 2, 1).reshape(N, z_dims)
    if num_ws is None:
        return z
    return jnp.repeat(z[:, None, :], num_ws, axis=1)    # z.unsqueeze(1).repeat


# ----------------------------------------------------------------------------
# Pure-JAX reference (un-folded params, standard ops) for correctness check
# ----------------------------------------------------------------------------
def ref_forward(params, x):
    plan = params['cfg']['plan']
    h = x.astype(jnp.float32)
    for L, (w, b, gamma, beta, mean, var) in zip(plan, params['raw_convs']):
        h = lax.conv_general_dilated(
            h, w, (1, 1), ((1, 1), (1, 1)),
            dimension_numbers=('NCHW', 'OIHW', 'NCHW'),
            precision=lax.Precision.HIGHEST)
        h = h + b[None, :, None, None]
        scale = gamma / jnp.sqrt(var + BN_EPS)
        h = h * scale[None, :, None, None] + (beta - mean * scale)[None, :, None, None]
        h = h * jnp.tanh(jax.nn.softplus(h))                      # exact Mish
        if L['pool']:
            Nb, C, H, W = h.shape
            h = h.reshape(Nb, C, H // 2, 2, W // 2, 2).mean(axis=(3, 5))
    fc_w, fc_b = params['raw_fc']
    z = jnp.matmul(h.reshape(h.shape[0], -1), fc_w,
                   precision=lax.Precision.HIGHEST) + fc_b[None, :]
    return z


if __name__ == "__main__":
    key = jax.random.PRNGKey(0)
    pkey, xkey = jax.random.split(key)

    # Small configuration consistent with the module's constraints:
    # input 16x16 -> smallest 4x4 => 2 down blocks; nc = [8, 16, 32], z_dims=32.
    cfg = dict(input_imsize=16, smallest_imsize=4, z_dims=32,
               nc_in=3, nc_base=8, n_layers_per_res=(2, 2))
    num_ws = None   # module default

    params = init_z_encoder(pkey, **cfg)
    N = 4
    x = jax.random.normal(
        xkey, (N, cfg['nc_in'], cfg['input_imsize'], cfg['input_imsize']),
        jnp.float32)

    z = z_encoder_forward(params, x, num_ws=num_ws, images_per_step=2)
    jax.block_until_ready(z)

    expected = (N, cfg['z_dims']) if num_ws is None else (N, num_ws, cfg['z_dims'])
    assert z.shape == expected, z.shape
    assert bool(jnp.all(jnp.isfinite(z)))

    # numerical check against a pure-JAX reference built from the raw params
    z_ref = ref_forward(params, x)
    err = float(jnp.max(jnp.abs(z - z_ref)))
    assert err < 5e-2, f"mismatch vs reference: max abs err {err}"

    print("KERNEL_OK")
</pallas_src>

<mosaic_0001>
module attributes {stable_mosaic.version = 11 : i64} {
  func.func @k(%arg0: memref<8x128xf32, #tpu.memory_space<vmem>>, %arg1: memref<8x128xf32, #tpu.memory_space<vmem>>) attributes {dimension_semantics = [], scalar_prefetch = 0 : i64, scratch_operands = 0 : i64, tpu.core_type = #tpu.core_type<tc>} {
    %c0 = arith.constant 0 : index
    %c0_0 = arith.constant 0 : index
    %0 = vector.load %arg0[%c0, %c0_0] : memref<8x128xf32, #tpu.memory_space<vmem>>, vector<8x128xf32>
    %c1_i32 = arith.constant 1 : i32
    %1 = tpu.dynamic_rotate %0 by %c1_i32 dim 1 : vector<8x128xf32>, i32 -> vector<8x128xf32>
    %c0_1 = arith.constant 0 : index
    %c0_2 = arith.constant 0 : index
    %2 = vector.load %arg1[%c0_1, %c0_2] : memref<8x128xf32, #tpu.memory_space<vmem>>, vector<8x128xf32>
    tpu.vector_store %arg1[%c0_1, %c0_2], %1 {strides = array<i32>} : memref<8x128xf32, #tpu.memory_space<vmem>>, vector<8x128xf32>,
    return
  }
}

</mosaic_0001>

<bundles_post_ra>
// kernel: tpu_custom_call.1
= control target key start
LH: loop header
LB: loop body
LE: loop exit
PB: predicated region body
PF: predicated region fallthrough
CT: control target
= control target key end

     0   :  { %6 = vsyncpa [#allocation3], 0  ;;  %s118_s0 = inlined_call_operand.hbm [shape: f32[8,128], index: 0, kind: input, shape index: {}]   ;;  %s119_s1 = inlined_call_operand.hbm [shape: f32[8,128], index: 1, kind: output, shape index: {}]  }
   0x1   :  { %7 = vsyncpa [#allocation4], 0  ;;  %s13_s8 = sshll.u32 %s118_s0, 4  ;;  %s99_s9 = smov [#allocation2]   ;;  %s14_s8 = int_to_ptr.hbm [resolvable:$true] %s13_s8 }
   0x2   :  { %s15_s10 = sshll.u32 %s99_s9, 4  ;;  %s16_s10 = int_to_ptr.vmem [resolvable:$true] %s15_s10 }
   0x3   :  { %18 = dma.hbm_to_vmem [thread:$0]  %s14_s8, 128, %s16_s10, [#allocation3]  }
   0x4   :  { %95 = dma.done.wait [#allocation3], 128  }
   0x5   :  { %96 = vsyncadd [#allocation3], 4294967168  ;;  %v23_v0 = vld [vmem:[#allocation2] sm:$0xff]  ;;  %s100_s11 = smov 1   ;;  %s101_s12 = smov [#allocation5]  }
   0x6   :  { %24 = vrot.lane.b32.xlu0 %v23_v0, %s100_s11  ;;  %s32_s13 = sshll.u32 %s101_s12, 4  ;;  %s34_s16 = sshll.u32 %s119_s1, 4  ;;  %s33_s13 = int_to_ptr.vmem [resolvable:$true] %s32_s13  ;;  %s35_s16 = int_to_ptr.hbm [resolvable:$true] %s34_s16 }
  0x78   :  { %v25_v1 = vpop.permute.xlu0 %24 }
  0x79   :  { %26 = vst [vmem:[#allocation5] sm:$0xff] %v25_v1 }
  0x7a   :  { %37 = dma.vmem_to_hbm [thread:$0]  %s33_s13, 128, %s35_s16, [#allocation4]  }
  0x7b   :  { %97 = dma.done.wait [#allocation4], 128  }
  0x7c   :  { %98 = vsyncadd [#allocation4], 4294967168 }
  0x7d   :  { %42 = vsyncpa [#allocation3], 1 }
  0x7e   :  { %43 = vsyncpa [#allocation4], 1 }

</bundles_post_ra>
